<compile_context>
chip_gen: v7x
topology: tpu7x:2x2x1
jax: 0.10.0
libtpu: 0.0.40
codegen_flags: <defaults>
</compile_context>

<pallas_src>
import functools

import jax
import jax.numpy as jnp
from jax.experimental import pallas as pl
from jax.experimental.pallas import tpu as pltpu

SUB = 8                 # sublane quantum (feature padding)
MIN_TB = 128            # minimum batch tile (lane quantum)
DEFAULT_TB = 8192       # maximum batch tile (lanes per grid step)
MIN_PALLAS_BATCH = 256  # below this, plain XLA wins (dispatch-bound regime)

# Layer sizes of FeedForwardNN(state_size): state -> 3 -> 9 -> 18 -> 9 -> 1
HIDDEN_SIZES = [3, 9, 18, 9, 1]


def _round_up(n, m):
    return ((n + m - 1) // m) * m


def _mlp_kernel(x_ref,
                w1, b1, w2, b2, w3, b3, w4, b4, w5, b5,
                o_ref):
    """Fused 5-layer MLP on one (S, TB) tile; batch is on the lane axis.

    Weights/biases use constant index maps, so they are DMA'd once and stay
    VMEM-resident across the whole grid.  Weight layout: (fan_out_pad, fan_in_pad);
    bias layout: (fan_out_pad, 1), broadcast along lanes.
    """
    def lin(w_ref, h, b_ref):
        return jnp.dot(w_ref[...], h, preferred_element_type=jnp.float32) + b_ref[...]

    h = x_ref[...]                            # (S,  TB)
    h = jnp.maximum(lin(w1, h, b1), 0.0)      # (8,  TB)
    h = jnp.maximum(lin(w2, h, b2), 0.0)      # (16, TB)
    h = jnp.maximum(lin(w3, h, b3), 0.0)      # (24, TB)
    h = jnp.maximum(lin(w4, h, b4), 0.0)      # (16, TB)
    o_ref[...] = lin(w5, h, b5)[0:1, :]       # (1,  TB), no activation


def init_params(key, state_size):
    """Deterministic params matching PyTorch nn.Linear default init
    (uniform(-1/sqrt(fan_in), 1/sqrt(fan_in)) for weight and bias).
    Weights are (in_features, out_features)."""
    params = []
    fan_ins = [state_size] + HIDDEN_SIZES[:-1]
    for fan_in, fan_out in zip(fan_ins, HIDDEN_SIZES):
        key, kw, kb = jax.random.split(key, 3)
        bound = 1.0 / jnp.sqrt(jnp.float32(fan_in))
        w = jax.random.uniform(kw, (fan_in, fan_out), jnp.float32, -bound, bound)
        b = jax.random.uniform(kb, (fan_out,), jnp.float32, -bound, bound)
        params.append((w, b))
    return params


def pad_params(params):
    """Transpose + zero-pad parameters ONCE at setup (hoisted out of the call path).

    Weights become (fan_out_pad, fan_in_pad) with fan_out rounded up to 8 sublanes;
    layer 1 keeps the true state_size as its fan_in (no 128-lane input padding),
    and each later layer's fan_in equals the previous layer's padded fan_out.
    Biases become (fan_out_pad, 1).  Zero padding is semantics-preserving:
    padded bias = 0, relu(0) = 0, padded weight rows/cols = 0.
    """
    padded = []
    prev_out_pad = None
    for i, (w, b) in enumerate(params):
        fi, fo = w.shape
        in_pad = fi if i == 0 else prev_out_pad
        out_pad = _round_up(fo, SUB)
        wt = jnp.zeros((out_pad, in_pad), jnp.float32).at[:fo, :fi].set(w.T)
        bt = jnp.zeros((out_pad, 1), jnp.float32).at[:fo, 0].set(b)
        padded += [wt, bt]
        prev_out_pad = out_pad
    return tuple(padded)


@functools.partial(jax.jit, static_argnames=("block_b",))
def _feedforward_pallas(x, padded_params, block_b):
    B, S = x.shape
    xt = jnp.transpose(x.astype(jnp.float32))       # (S, B): batch on the lane axis

    const_map = lambda i: (0, 0)
    param_specs = [pl.BlockSpec(p.shape, const_map) for p in padded_params]

    out = pl.pallas_call(
        _mlp_kernel,
        out_shape=jax.ShapeDtypeStruct((1, B), jnp.float32),
        grid=(pl.cdiv(B, block_b),),                 # ragged last block is fine
        in_specs=[pl.BlockSpec((S, block_b), lambda i: (0, i))] + param_specs,
        out_specs=pl.BlockSpec((1, block_b), lambda i: (0, i)),
        compiler_params=pltpu.CompilerParams(
            dimension_semantics=("parallel",),       # megacore-shard the batch grid
            vmem_limit_bytes=32 * 1024 * 1024,
        ),
    )(xt, *padded_params)
    return out.reshape(B, 1)


def _pick_tile(batch, block_b=None):
    if block_b is not None:
        return max(MIN_TB, _round_up(block_b, MIN_TB))
    # Power-of-two tile in [128, 8192]: ceil(B/2) keeps >=2 grid steps whenever
    # B > 128 (both v7x TensorCores busy) while amortizing the ~0.35us/step
    # pipeline overhead; power-of-two bucketing bounds the number of compiles.
    return max(MIN_TB, min(DEFAULT_TB, pl.next_power_of_2(pl.cdiv(batch, 2))))


def feedforward_nn(x, padded_params, block_b=None):
    """x: (batch, state_size) float32 -> (batch, 1) float32, via the Pallas kernel.

    `padded_params` must come from pad_params() (padded once, reused per call).
    """
    B, _ = x.shape
    tb = _pick_tile(B, block_b)
    return _feedforward_pallas(x, padded_params, block_b=tb)


def feedforward_nn_ref(x, params):
    """Pure-JAX reference for correctness checking (uses the unpadded params)."""
    h = x.astype(jnp.float32)
    for i, (w, b) in enumerate(params):
        h = h @ w + b
        if i < len(params) - 1:
            h = jnp.maximum(h, 0.0)
    return h


def make_feedforward_fn(params, *, min_pallas_batch=MIN_PALLAS_BATCH, block_b=None):
    """Build a forward fn.  Pads params once; tiny batches go through plain XLA
    (kernel dispatch, DMA setup and the single grid step's overhead dwarf the math)."""
    padded = pad_params(params)
    xla_fn = jax.jit(lambda x: feedforward_nn_ref(x, params))

    def forward(x):
        if x.shape[0] < min_pallas_batch:
            return xla_fn(x)
        return feedforward_nn(x, padded, block_b=block_b)

    return forward


if __name__ == "__main__":
    key = jax.random.PRNGKey(0)
    state_size = 8

    kp, kx1, kx2 = jax.random.split(key, 3)
    params = init_params(kp, state_size)
    padded = pad_params(params)          # transposed/padded once, cached

    # Small batch, forced through the Pallas kernel (single ragged grid step).
    batch1 = 4
    x1 = jax.random.normal(kx1, (batch1, state_size), jnp.float32)
    out1 = jax.block_until_ready(feedforward_nn(x1, padded))
    ref1 = feedforward_nn_ref(x1, params)
    assert out1.shape == (batch1, 1), out1.shape
    assert jnp.allclose(out1, ref1, atol=1e-5, rtol=1e-5), (out1, ref1)

    # Larger, non-multiple-of-tile batch: multi-step grid (>=2 steps so the
    # 'parallel' axis can shard across v7x cores) with a ragged last block.
    batch2 = 1037
    x2 = jax.random.normal(kx2, (batch2, state_size), jnp.float32)
    out2 = jax.block_until_ready(feedforward_nn(x2, padded))
    ref2 = feedforward_nn_ref(x2, params)
    assert out2.shape == (batch2, 1), out2.shape
    assert jnp.allclose(out2, ref2, atol=1e-4, rtol=1e-4)

    # Auto-dispatch wrapper: tiny batch routes to plain XLA, same numerics.
    fwd = make_feedforward_fn(params)
    out3 = jax.block_until_ready(fwd(x1))
    assert jnp.allclose(out3, ref1, atol=1e-5, rtol=1e-5)

    print("KERNEL_OK")
</pallas_src>

<mosaic_0001>
module attributes {stable_mosaic.version = 11 : i64} {
  func.func @_mlp_kernel(%arg0: i32, %arg1: memref<8x128xf32, #tpu.memory_space<vmem>>, %arg2: memref<8x8xf32, #tpu.memory_space<vmem>>, %arg3: memref<8x1xf32, #tpu.memory_space<vmem>>, %arg4: memref<16x8xf32, #tpu.memory_space<vmem>>, %arg5: memref<16x1xf32, #tpu.memory_space<vmem>>, %arg6: memref<24x16xf32, #tpu.memory_space<vmem>>, %arg7: memref<24x1xf32, #tpu.memory_space<vmem>>, %arg8: memref<16x24xf32, #tpu.memory_space<vmem>>, %arg9: memref<16x1xf32, #tpu.memory_space<vmem>>, %arg10: memref<8x16xf32, #tpu.memory_space<vmem>>, %arg11: memref<8x1xf32, #tpu.memory_space<vmem>>, %arg12: memref<1x128xf32, #tpu.memory_space<vmem>>) attributes {dimension_semantics = [#tpu.dimension_semantics<parallel>], iteration_bounds = array<i64: 1>, scalar_prefetch = 0 : i64, scratch_operands = 0 : i64, tpu.core_type = #tpu.core_type<tc>, window_params = [{transform_indices = @transform_0, window_bounds = array<i64: 8, 128>}, {pipeline_mode = #tpu.pipeline_mode<synchronous>, transform_indices = @transform_1, window_bounds = array<i64: 8, 8>}, {pipeline_mode = #tpu.pipeline_mode<synchronous>, transform_indices = @transform_2, window_bounds = array<i64: 8, 1>}, {pipeline_mode = #tpu.pipeline_mode<synchronous>, transform_indices = @transform_3, window_bounds = array<i64: 16, 8>}, {pipeline_mode = #tpu.pipeline_mode<synchronous>, transform_indices = @transform_4, window_bounds = array<i64: 16, 1>}, {pipeline_mode = #tpu.pipeline_mode<synchronous>, transform_indices = @transform_5, window_bounds = array<i64: 24, 16>}, {pipeline_mode = #tpu.pipeline_mode<synchronous>, transform_indices = @transform_6, window_bounds = array<i64: 24, 1>}, {pipeline_mode = #tpu.pipeline_mode<synchronous>, transform_indices = @transform_7, window_bounds = array<i64: 16, 24>}, {pipeline_mode = #tpu.pipeline_mode<synchronous>, transform_indices = @transform_8, window_bounds = array<i64: 16, 1>}, {pipeline_mode = #tpu.pipeline_mode<synchronous>, transform_indices = @transform_9, window_bounds = array<i64: 8, 16>}, {pipeline_mode = #tpu.pipeline_mode<synchronous>, transform_indices = @transform_10, window_bounds = array<i64: 8, 1>}, {transform_indices = @transform_11, window_bounds = array<i64: 1, 128>}]} {
    %c0 = arith.constant 0 : index
    %c0_0 = arith.constant 0 : index
    %0 = vector.load %arg1[%c0, %c0_0] : memref<8x128xf32, #tpu.memory_space<vmem>>, vector<8x128xf32>
    %c0_1 = arith.constant 0 : index
    %c0_2 = arith.constant 0 : index
    %1 = vector.load %arg2[%c0_1, %c0_2] : memref<8x8xf32, #tpu.memory_space<vmem>>, vector<8x8xf32>
    %cst = arith.constant dense<0.000000e+00> : vector<8x128xf32>
    %2 = tpu.matmul %1, %0, %cst {dimension_numbers = #tpu.dot_dimension_numbers<[1], [0], [0], [1], [0, 0, 1, 1], [], []>} : vector<8x8xf32>, vector<8x128xf32>, vector<8x128xf32> -> vector<8x128xf32>
    %c0_3 = arith.constant 0 : index
    %c0_4 = arith.constant 0 : index
    %3 = vector.load %arg3[%c0_3, %c0_4] : memref<8x1xf32, #tpu.memory_space<vmem>>, vector<8x1xf32>
    %4 = vector.broadcast %3 : vector<8x1xf32> to vector<8x128xf32>
    %5 = arith.addf %2, %4 : vector<8x128xf32>
    %cst_5 = arith.constant 0.000000e+00 : f32
    %6 = vector.broadcast %cst_5 : f32 to vector<8x128xf32>
    %7 = arith.maximumf %5, %6 : vector<8x128xf32>
    %c0_6 = arith.constant 0 : index
    %c0_7 = arith.constant 0 : index
    %8 = vector.load %arg4[%c0_6, %c0_7] : memref<16x8xf32, #tpu.memory_space<vmem>>, vector<16x8xf32>
    %cst_8 = arith.constant dense<0.000000e+00> : vector<16x128xf32>
    %9 = tpu.matmul %8, %7, %cst_8 {dimension_numbers = #tpu.dot_dimension_numbers<[1], [0], [0], [1], [0, 0, 1, 1], [], []>} : vector<16x8xf32>, vector<8x128xf32>, vector<16x128xf32> -> vector<16x128xf32>
    %c0_9 = arith.constant 0 : index
    %c0_10 = arith.constant 0 : index
    %10 = vector.load %arg5[%c0_9, %c0_10] : memref<16x1xf32, #tpu.memory_space<vmem>>, vector<16x1xf32>
    %11 = vector.broadcast %10 : vector<16x1xf32> to vector<16x128xf32>
    %12 = arith.addf %9, %11 : vector<16x128xf32>
    %cst_11 = arith.constant 0.000000e+00 : f32
    %13 = vector.broadcast %cst_11 : f32 to vector<16x128xf32>
    %14 = arith.maximumf %12, %13 : vector<16x128xf32>
    %c0_12 = arith.constant 0 : index
    %c0_13 = arith.constant 0 : index
    %15 = vector.load %arg6[%c0_12, %c0_13] : memref<24x16xf32, #tpu.memory_space<vmem>>, vector<24x16xf32>
    %cst_14 = arith.constant dense<0.000000e+00> : vector<24x128xf32>
    %16 = tpu.matmul %15, %14, %cst_14 {dimension_numbers = #tpu.dot_dimension_numbers<[1], [0], [0], [1], [0, 0, 1, 1], [], []>} : vector<24x16xf32>, vector<16x128xf32>, vector<24x128xf32> -> vector<24x128xf32>
    %c0_15 = arith.constant 0 : index
    %c0_16 = arith.constant 0 : index
    %17 = vector.load %arg7[%c0_15, %c0_16] : memref<24x1xf32, #tpu.memory_space<vmem>>, vector<24x1xf32>
    %18 = vector.broadcast %17 : vector<24x1xf32> to vector<24x128xf32>
    %19 = arith.addf %16, %18 : vector<24x128xf32>
    %cst_17 = arith.constant 0.000000e+00 : f32
    %20 = vector.broadcast %cst_17 : f32 to vector<24x128xf32>
    %21 = arith.maximumf %19, %20 : vector<24x128xf32>
    %c0_18 = arith.constant 0 : index
    %c0_19 = arith.constant 0 : index
    %22 = vector.load %arg8[%c0_18, %c0_19] : memref<16x24xf32, #tpu.memory_space<vmem>>, vector<16x24xf32>
    %cst_20 = arith.constant dense<0.000000e+00> : vector<16x128xf32>
    %23 = tpu.matmul %22, %21, %cst_20 {dimension_numbers = #tpu.dot_dimension_numbers<[1], [0], [0], [1], [0, 0, 1, 1], [], []>} : vector<16x24xf32>, vector<24x128xf32>, vector<16x128xf32> -> vector<16x128xf32>
    %c0_21 = arith.constant 0 : index
    %c0_22 = arith.constant 0 : index
    %24 = vector.load %arg9[%c0_21, %c0_22] : memref<16x1xf32, #tpu.memory_space<vmem>>, vector<16x1xf32>
    %25 = vector.broadcast %24 : vector<16x1xf32> to vector<16x128xf32>
    %26 = arith.addf %23, %25 : vector<16x128xf32>
    %cst_23 = arith.constant 0.000000e+00 : f32
    %27 = vector.broadcast %cst_23 : f32 to vector<16x128xf32>
    %28 = arith.maximumf %26, %27 : vector<16x128xf32>
    %c0_24 = arith.constant 0 : index
    %c0_25 = arith.constant 0 : index
    %29 = vector.load %arg10[%c0_24, %c0_25] : memref<8x16xf32, #tpu.memory_space<vmem>>, vector<8x16xf32>
    %cst_26 = arith.constant dense<0.000000e+00> : vector<8x128xf32>
    %30 = tpu.matmul %29, %28, %cst_26 {dimension_numbers = #tpu.dot_dimension_numbers<[1], [0], [0], [1], [0, 0, 1, 1], [], []>} : vector<8x16xf32>, vector<16x128xf32>, vector<8x128xf32> -> vector<8x128xf32>
    %c0_27 = arith.constant 0 : index
    %c0_28 = arith.constant 0 : index
    %31 = vector.load %arg11[%c0_27, %c0_28] : memref<8x1xf32, #tpu.memory_space<vmem>>, vector<8x1xf32>
    %32 = vector.broadcast %31 : vector<8x1xf32> to vector<8x128xf32>
    %33 = arith.addf %30, %32 : vector<8x128xf32>
    %34 = vector.extract_strided_slice %33 {offsets = [0, 0], sizes = [1, 128], strides = [1, 1]} : vector<8x128xf32> to vector<1x128xf32>
    %c0_29 = arith.constant 0 : index
    %c0_30 = arith.constant 0 : index
    %35 = vector.load %arg12[%c0_29, %c0_30] : memref<1x128xf32, #tpu.memory_space<vmem>>, vector<1x128xf32>
    tpu.vector_store %arg12[%c0_29, %c0_30], %34 {strides = array<i32>} : memref<1x128xf32, #tpu.memory_space<vmem>>, vector<1x128xf32>,
    return
  }
  func.func @transform_0(%arg0: i32) -> (i32, i32) {
    %c0_i32 = arith.constant 0 : i32
    %c0_i32_0 = arith.constant 0 : i32
    return %c0_i32, %arg0 : i32, i32
  }
  func.func @transform_1(%arg0: i32) -> (i32, i32) {
    %c0_i32 = arith.constant 0 : i32
    %c0_i32_0 = arith.constant 0 : i32
    %c0_i32_1 = arith.constant 0 : i32
    return %c0_i32, %c0_i32_0 : i32, i32
  }
  func.func @transform_2(%arg0: i32) -> (i32, i32) {
    %c0_i32 = arith.constant 0 : i32
    %c0_i32_0 = arith.constant 0 : i32
    %c0_i32_1 = arith.constant 0 : i32
    return %c0_i32, %c0_i32_0 : i32, i32
  }
  func.func @transform_3(%arg0: i32) -> (i32, i32) {
    %c0_i32 = arith.constant 0 : i32
    %c0_i32_0 = arith.constant 0 : i32
    %c0_i32_1 = arith.constant 0 : i32
    return %c0_i32, %c0_i32_0 : i32, i32
  }
  func.func @transform_4(%arg0: i32) -> (i32, i32) {
    %c0_i32 = arith.constant 0 : i32
    %c0_i32_0 = arith.constant 0 : i32
    %c0_i32_1 = arith.constant 0 : i32
    return %c0_i32, %c0_i32_0 : i32, i32
  }
  func.func @transform_5(%arg0: i32) -> (i32, i32) {
    %c0_i32 = arith.constant 0 : i32
    %c0_i32_0 = arith.constant 0 : i32
    %c0_i32_1 = arith.constant 0 : i32
    return %c0_i32, %c0_i32_0 : i32, i32
  }
  func.func @transform_6(%arg0: i32) -> (i32, i32) {
    %c0_i32 = arith.constant 0 : i32
    %c0_i32_0 = arith.constant 0 : i32
    %c0_i32_1 = arith.constant 0 : i32
    return %c0_i32, %c0_i32_0 : i32, i32
  }
  func.func @transform_7(%arg0: i32) -> (i32, i32) {
    %c0_i32 = arith.constant 0 : i32
    %c0_i32_0 = arith.constant 0 : i32
    %c0_i32_1 = arith.constant 0 : i32
    return %c0_i32, %c0_i32_0 : i32, i32
  }
  func.func @transform_8(%arg0: i32) -> (i32, i32) {
    %c0_i32 = arith.constant 0 : i32
    %c0_i32_0 = arith.constant 0 : i32
    %c0_i32_1 = arith.constant 0 : i32
    return %c0_i32, %c0_i32_0 : i32, i32
  }
  func.func @transform_9(%arg0: i32) -> (i32, i32) {
    %c0_i32 = arith.constant 0 : i32
    %c0_i32_0 = arith.constant 0 : i32
    %c0_i32_1 = arith.constant 0 : i32
    return %c0_i32, %c0_i32_0 : i32, i32
  }
  func.func @transform_10(%arg0: i32) -> (i32, i32) {
    %c0_i32 = arith.constant 0 : i32
    %c0_i32_0 = arith.constant 0 : i32
    %c0_i32_1 = arith.constant 0 : i32
    return %c0_i32, %c0_i32_0 : i32, i32
  }
  func.func @transform_11(%arg0: i32) -> (i32, i32) {
    %c0_i32 = arith.constant 0 : i32
    %c0_i32_0 = arith.constant 0 : i32
    return %c0_i32, %arg0 : i32, i32
  }
}

</mosaic_0001>

<bundles_post_ra>
// kernel: _feedforward_pallas.1
= control target key start
LH: loop header
LB: loop body
LE: loop exit
PB: predicated region body
PF: predicated region fallthrough
CT: control target
= control target key end

     0   :  { %vm47_vm0 = vcmask 64512   ;;  %v633_v2 = vmov 0.0   ;;  %vm634_vm1 = vmmov 0   ;;  %v635_v4 = vmov 0   ;;  %s787_s0 = inlined_call_operand.vmem [shape: f32[8,4], index: 0, kind: input, shape index: {}]   ;;  %s788_s1 = inlined_call_operand.vmem [shape: f32[8,8], index: 1, kind: input, shape index: {}]   ;;  %s789_s2 = inlined_call_operand.vmem [shape: f32[8,1], index: 2, kind: input, shape index: {}]   ;;  %s790_s3 = inlined_call_operand.vmem [shape: f32[16,8], index: 3, kind: input, shape index: {}]   ;;  %s791_s4 = inlined_call_operand.vmem [shape: f32[16,1], index: 4, kind: input, shape index: {}]   ;;  %s792_s5 = inlined_call_operand.vmem [shape: f32[24,16], index: 5, kind: input, shape index: {}]   ;;  %s793_s6 = inlined_call_operand.vmem [shape: f32[24,1], index: 6, kind: input, shape index: {}]   ;;  %s794_s7 = inlined_call_operand.vmem [shape: f32[16,24], index: 7, kind: input, shape index: {}]   ;;  %s795_s8 = inlined_call_operand.vmem [shape: f32[16,1], index: 8, kind: input, shape index: {}]   ;;  %s796_s9 = inlined_call_operand.vmem [shape: f32[8,16], index: 9, kind: input, shape index: {}]   ;;  %s797_s10 = inlined_call_operand.vmem [shape: f32[8,1], index: 10, kind: input, shape index: {}]   ;;  %s798_s11 = inlined_call_operand.hbm [shape: f32[1,4], index: 11, kind: output, shape index: {}]  }
   0x1   :  { %v39_v0 = vld [vmem:[%s787_s0] sm:$0xff]  ;;  %553 = vmatprep.subr.mxu0 %v633_v2  ;;  %555 = vmatprep.mubr.msk.f32.mxu0 %vm634_vm1, %v633_v2 }
   0x2   :  { %v40_v1 = vld [vmem:[%s788_s1] sm:$0xff]  ;;  %554 = vmatpush3.msra.mxu0 %v39_v0  ;;  %607 = vset.pattern.permute.xlu0 %v635_v4 }
   0x3   :  { %v41_v3 = vld [vmem:[%s789_s2] sm:$0xff] }
   0x4   :  { %16 = vsyncpa [#allocation3], 0  ;;  %556 = vmatmul.mubr.msk.f32.vlgmr.msra.gmra.mrb[0].mxu0 %vm47_vm0, %v40_v1  ;;  %44 = vperm.xlu0 %607, %v41_v3   ;;  %v124_v5 = vld [vmem:[%s791_s4] sm:$0xff]  ;;  %v223_v6 = vld [vmem:[%s793_s6 + $0x8] sm:$0xff]  ;;  %v636_v20 = vmov 0.0|0.0   ;;  %vm240_vm2 = vcmask 130048  }
   0x5   :  { %608 = vset.pattern.permute.xlu1 %v635_v4  ;;  %567 = vmatprep.mubr.msk.f32.mxu0 %vm634_vm1, %v633_v2  ;;  %v335_v7 = vld [vmem:[%s795_s8] sm:$0xff]  ;;  %v125_v10 = vld [vmem:[%s791_s4 + $0x8] sm:$0xff]  ;;  %v224_v12 = vld [vmem:[%s793_s6 + $0x10] sm:$0xff]  ;;  %vm347_vm3 = vcmask 195584  }
   0x6   :  { %v432_v8 = vld [vmem:[%s797_s10] sm:$0xff]  ;;  %133 = vperm.xlu1 %608, %v125_v10   ;;  %v336_v13 = vld [vmem:[%s795_s8 + $0x8] sm:$0xff]  ;;  %592 = vmatprep.subr.bf16.mxu0 %v636_v20  ;;  %v221_v32 = vld [vmem:[%s792_s5 + $0x10] sm:$0xff] }
   0x7   :  { %v122_v9 = vld [vmem:[%s790_s3] sm:$0xff]  ;;  %v123_v19 = vld [vmem:[%s790_s3 + $0x8] sm:$0xff] }
   0x8   :  { %128 = vperm.xlu0 %607, %v124_v5   ;;  %560 = vmatprep.mubr.msk.f32.mxu1 %vm47_vm0, %v122_v9  ;;  %v222_v11 = vld [vmem:[%s793_s6] sm:$0xff]  ;;  %v220_v31 = vld [vmem:[%s792_s5 + $0x8] sm:$0xff] }
   0x9   :  { %v219_v30 = vld [vmem:[%s792_s5] sm:$0xff]  ;;  %v334_v50 = vld [vmem:[%s794_s7 + $0x8] sm:$0xff] }
   0xa   :  { %227 = vperm.xlu1 %608, %v222_v11   ;;  %v333_v33 = vld [vmem:[%s794_s7] sm:$0xff]  ;;  %s637_s7 = smov [#allocation2]  }
   0xb   :  { %v431_v60 = vld [vmem:[%s796_s9] sm:$0xff]  ;;  %s518_s2 = sshll.u32 %s637_s7, 4  ;;  %s519_s2 = int_to_ptr.vmem [resolvable:$true] %s518_s2 }
   0xc   :  { %232 = vperm.xlu0 %607, %v223_v6   ;;  %s609_s25 = scalar_lea.vmem %s519_s2, 16  ;;  %s613_s26 = scalar_lea.vmem %s519_s2, 32 }
   0xd   :  { %p610_p0 = scmp.ne.s32.totalorder %s519_s2, %s609_s25  ;;  %p614_p1 = scmp.lt.s32.totalorder %s519_s2, %s519_s2 }
   0xe   :  { %237 = vperm.xlu1 %608, %v224_v12   ;;  %p615_p2 = scmp.lt.s32.totalorder %s613_s26, %s609_s25 }
  0x10   :  { %339 = vperm.xlu0 %607, %v335_v7   ;;  %p616_p3 = por %p615_p2, %p614_p1 }
  0x12   :  { %344 = vperm.xlu1 %608, %v336_v13   ;;  %p617_p4 = pnand %p616_p3, %p610_p0 }
  0x14   :  { %435 = vperm.xlu0 %607, %v432_v8  }
  0x83   :  { %v45_v14 = vpop.permute.xlu0 %44 }
  0x85   :  { %v134_v21 = vpop.permute.xlu1 %133 }
  0x87   :  { %v129_v23 = vpop.permute.xlu0 %128 }
  0x89   :  { %v228_v36 = vpop.permute.xlu1 %227 }
  0x8b   :  { %v233_v38 = vpop.permute.xlu0 %232 }
  0x8d   :  { %v238_v44 = vpop.permute.xlu1 %237 }
  0x8f   :  { %v340_v53 = vpop.permute.xlu0 %339 }
  0x91   :  { %v345_v51 = vpop.permute.xlu1 %344 }
  0x93   :  { %v436_v61 = vpop.permute.xlu0 %435 }
  0xd7   :  { %v117_v15 = vpop.f32.mrb[0].mxu0 }
  0xd8   :  { %v118_v16 = vadd.f32 %v117_v15, %v45_v14  ;;  %v557_v17 = vpop.f32.mrb[1].mxu0 }
  0xda   :  { %v121_v18 = vmax.f32 %v118_v16, 0.0 }
  0xdc   :  { %558 = vmatprep.subr.mxu1 %v121_v18 }
  0xdd   :  { %559 = vmatpush3.msra.mxu1 %v121_v18 }
  0xde   :  { %561 = vmatmul.mubr.msk.f32.vlgmr.msra.gmra.mrb[0].mxu1 %vm47_vm0, %v123_v19 }
  0xdf   :  { %582 = vmatprep.mubr.msk.f32.mxu1 %vm347_vm3, %v333_v33 }
 0x1b1   :  { %v562_v22 = vpop.f32.mrb[0].mxu1 }
 0x1b2   :  { %v214_v24 = vadd.f32 %v562_v22, %v134_v21  ;;  %v208_v25 = vpop.f32.mrb[1].mxu1 }
 0x1b3   :  { %v209_v26 = vadd.f32 %v208_v25, %v129_v23 }
 0x1b4   :  { %v218_v27 = vmax.f32 %v214_v24, 0.0 }
 0x1b5   :  { %v217_v28 = vmax.f32 %v209_v26, 0.0 }
 0x1b7   :  { %v593_v29 = vpack.c.bf16 %v218_v27, %v217_v28 }
 0x1b9   :  { %594 = vmatpush3.bf16.msra.mxu0 %v593_v29 }
 0x1bc   :  { %568 = vmatmul.mubr.msk.f32.vlgmr.msra.gmra.mrb[2].mxu0 %vm240_vm2, %v219_v30 }
 0x1bd   :  { %570 = vmatprep.mubr.msk.f32.mxu0 %vm634_vm1, %v633_v2 }
 0x1c0   :  { %571 = vmatmul.mubr.msk.f32.gmra.mrb[4].mxu0 %vm240_vm2, %v220_v31 }
 0x1c1   :  { %573 = vmatprep.mubr.msk.f32.mxu0 %vm634_vm1, %v633_v2 }
 0x1c4   :  { %574 = vmatmul.mubr.msk.f32.gmra.mrb[6].mxu0 %vm240_vm2, %v221_v32 }
 0x28f   :  { %v316_v34 = vpop.f32.mrb[2].mxu0 }
 0x290   :  { %v569_v35 = vpop.f32.mrb[3].mxu0  ;;  %v317_v37 = vadd.f32 %v316_v34, %v228_v36 }
 0x292   :  { %v330_v42 = vmax.f32 %v317_v37, 0.0 }
 0x293   :  { %v321_v39 = vpop.f32.mrb[4].mxu0 }
 0x294   :  { %v322_v40 = vadd.f32 %v321_v39, %v233_v38  ;;  %v572_v41 = vpop.f32.mrb[5].mxu0 }
 0x296   :  { %v331_v43 = vmax.f32 %v322_v40, 0.0 }
 0x297   :  { %v326_v45 = vpop.f32.mrb[6].mxu0 }
 0x298   :  { %v595_v46 = vpack.c.bf16 %v331_v43, %v330_v42  ;;  %v327_v47 = vadd.f32 %v326_v45, %v238_v44  ;;  %v575_v48 = vpop.f32.mrb[7].mxu0 }
 0x29a   :  { %v332_v49 = vmax.f32 %v327_v47, 0.0  ;;  %596 = vmatprep.subr.bf16.mxu1 %v595_v46 }
 0x29b   :  { %598 = vmatpush3.bf16.msra.mxu1 %v595_v46 }
 0x29c   :  { %580 = vmatprep.subr.mxu1 %v332_v49 }
 0x29f   :  { %581 = vmatpush3.msra.mxu1 %v332_v49 }
 0x2a0   :  { %583 = vmatmul.mubr.msk.f32.vlgmr.msra.gmra.mrb[2].mxu1 %vm347_vm3, %v334_v50  ;;  %599 = vmatprep.subr.bf16.mxu1 %v636_v20 }
 0x2a1   :  { %589 = vmatprep.mubr.msk.f32.mxu1 %vm634_vm1, %v633_v2 }
 0x373   :  { %v584_v52 = vpop.f32.mrb[2].mxu1 }
 0x374   :  { %v426_v54 = vadd.f32 %v584_v52, %v345_v51  ;;  %v420_v55 = vpop.f32.mrb[3].mxu1 }
 0x375   :  { %v421_v56 = vadd.f32 %v420_v55, %v340_v53 }
 0x376   :  { %v430_v57 = vmax.f32 %v426_v54, 0.0 }
 0x377   :  { %v429_v58 = vmax.f32 %v421_v56, 0.0 }
 0x379   :  { %v600_v59 = vpack.c.bf16 %v430_v57, %v429_v58 }
 0x37b   :  { %601 = vmatpush3.bf16.msra.mxu1 %v600_v59 }
 0x37e   :  { %590 = vmatmul.mubr.msk.f32.vlgmr.msra.gmra.mrb[4].mxu1 %vm240_vm2, %v431_v60 }
 0x451   :  { %v507_v62 = vpop.f32.mrb[4].mxu1 }
 0x452   :  { %v508_v63 = vadd.f32 %v507_v62, %v436_v61  ;;  %v591_v0 = vpop.f32.mrb[5].mxu1 }
 0x454   :  { %511 = vst [vmem:[#allocation2] sm:$0x1] %v508_v63 }
 0x455   :  { %620 = shalt.err (!%p617_p4)
}
 0x456   :  { %s621_s28 = scalar_lea.hbm %s798_s11, 16 }
 0x457   :  { %p622_p5 = scmp.ne.s32.totalorder %s798_s11, %s621_s28  ;;  %p625_p6 = scmp.lt.u32.totalorder %s621_s28, %s798_s11 }
 0x459   :  { %p627_p7 = pnand %p625_p6, %p622_p5 }
 0x45b   :  { %630 = shalt.err (!%p627_p7)
}
 0x45c   :  { %521 = dma.vmem_to_hbm [thread:$0]  %s519_s2, 16, %s798_s11, [#allocation3]  }
 0x45d   :  { %631 = dma.done.wait [#allocation3], 16  }
 0x45e   :  { %632 = vsyncadd [#allocation3], 4294967280 }
 0x45f   :  { %525 = vsyncpa [#allocation3], 1 }

</bundles_post_ra>
